<compile_context>
chip_gen: v6e
topology: v6e:2x2x1
jax: 0.10.0
libtpu: 0.0.40
codegen_flags: <defaults>
</compile_context>

<pallas_src>
import math
import jax
import jax.numpy as jnp
from jax.experimental import pallas as pl
from jax.experimental.pallas import tpu as pltpu


def _round_up(n, m):
    return ((n + m - 1) // m) * m


def _mlp_kernel(xt_ref, w1_ref, b1_ref, w2_ref, b2_ref, w3_ref, b3_ref, o_ref):
    # xt: (IN, TB) lane-dense batch tile (f32 or bf16)
    # w1: (64, IN)  b1: (64, 1)     -- PyTorch-native [out, in] layouts
    # w2: (64, 64)  b2: (64, 1)
    # w3: (64, 1)   b3: (1,) in SMEM
    # o : (1, TB) lane-dense output row for this batch tile
    xt = xt_ref[...]

    # Layer 1: h1^T = relu(W1 @ x^T + b1) -> (64, TB), batch on lanes.
    h1t = jnp.dot(w1_ref[...], xt, preferred_element_type=jnp.float32)
    h1t = jnp.maximum(h1t + b1_ref[...], 0.0)

    # Layer 2: h2^T = relu(W2 @ h1^T + b2) -> (64, TB), plain "nn" matmul.
    h2t = jnp.dot(w2_ref[...], h1t.astype(w2_ref.dtype),
                  preferred_element_type=jnp.float32)
    h2t = jnp.maximum(h2t + b2_ref[...], 0.0)

    # Head (64 -> 1): VPU multiply + sublane (XLU) reduction; avoids an N=1
    # MXU pass and keeps the result lane-dense.
    y = jnp.sum(h2t * w3_ref[...], axis=0, keepdims=True) + b3_ref[0]
    o_ref[...] = y.astype(o_ref.dtype)


def feed_forward_regressor(x, params, *, tile_b=8192, use_bf16=False,
                           vmem_budget_bytes=24 * 1024 * 1024):
    """x: (B, input_size) float32. Returns (B, 1) float32."""
    w1, b1, w2, b2, w3, b3 = params
    B, in_size = x.shape
    assert w1.shape == (64, in_size), w1.shape

    compute_dtype = jnp.bfloat16 if use_bf16 else jnp.float32
    x_bytes = 2 if use_bf16 else 4
    sublane = 16 if use_bf16 else 8

    # ---- batch-tile sizing from a VMEM budget -------------------------------
    # Per batch column (lane): double-buffered (in, tb) x tile (sublane padded),
    # ~4 f32 (64, tb) intermediates, double-buffered (1, tb) output (>=8 sublanes).
    per_col = (2 * _round_up(in_size, sublane) * x_bytes
               + 4 * 64 * 4
               + 2 * 8 * 4)
    tb_cap = max(128, (vmem_budget_bytes // per_col) // 128 * 128)
    tb = max(128, min(_round_up(tile_b, 128), tb_cap, 8192))
    # TODO(synk): for very large input_size (>~4K) add an inner "arbitrary" K
    # grid axis with an f32 VMEM accumulator instead of shrinking the batch tile.

    b_pad = _round_up(B, 128)
    if b_pad <= tb:
        # Whole batch fits one tile: split into two when possible so the
        # "parallel" grid axis keeps both v7x TensorCores busy (harmless
        # no-op on single-TC v5e/v6e).
        tb = b_pad if b_pad < 2 * 128 else ((b_pad // 128 + 1) // 2) * 128
    num_tiles = pl.cdiv(b_pad, tb)
    b_pad = num_tiles * tb

    # Batch-on-lanes layout: stream x pre-transposed as (in, tb) lane-dense tiles.
    xt = jnp.pad(x.astype(compute_dtype).T, ((0, 0), (0, b_pad - B)))
    w1c = w1.astype(compute_dtype)
    w2c = w2.astype(compute_dtype)

    const = lambda arr: pl.BlockSpec(arr.shape, lambda i: (0,) * arr.ndim)

    out = pl.pallas_call(
        _mlp_kernel,
        out_shape=jax.ShapeDtypeStruct((1, b_pad), jnp.float32),
        grid_spec=pltpu.PrefetchScalarGridSpec(
            num_scalar_prefetch=0,
            grid=(num_tiles,),
            in_specs=[
                pl.BlockSpec((in_size, tb), lambda i: (0, i)),       # x^T: streamed/pipelined
                const(w1c), const(b1),                               # weights: VMEM-resident
                const(w2c), const(b2),
                const(w3),
                pl.BlockSpec(memory_space=pltpu.MemorySpace.SMEM),   # b3 scalar in SMEM
            ],
            out_specs=pl.BlockSpec((1, tb), lambda i: (0, i)),       # lane-dense output slab
        ),
        compiler_params=pltpu.CompilerParams(
            dimension_semantics=("parallel",),   # megacore shards batch tiles (v7x)
            vmem_limit_bytes=32 * 1024 * 1024,   # 24 MiB budget + headroom; < v7x 64 MiB
        ),
    )(xt, w1c, b1, w2c, b2, w3, b3)

    return out[0, :B].reshape(B, 1)


def _xavier_uniform(key, shape, fan_in, fan_out):
    # torch.nn.init.xavier_uniform_ (gain=1): U(-a, a), a = sqrt(6/(fan_in+fan_out))
    a = math.sqrt(6.0 / (fan_in + fan_out))
    return jax.random.uniform(key, shape, jnp.float32, -a, a)


def _linear_bias(key, fan_in, shape):
    # torch nn.Linear default bias init: U(-1/sqrt(fan_in), 1/sqrt(fan_in))
    bound = 1.0 / math.sqrt(fan_in)
    return jax.random.uniform(key, shape, jnp.float32, -bound, bound)


def init_params(key, input_size):
    k = jax.random.split(key, 6)
    # Layouts chosen for the kernel (all batch-on-lanes, PyTorch [out, in]):
    #   w1: (64, in)  b1: (64, 1)
    #   w2: (64, 64)  b2: (64, 1)
    #   w3: (64, 1)   b3: (1,)
    w1 = _xavier_uniform(k[0], (64, input_size), input_size, 64)
    b1 = _linear_bias(k[1], input_size, (64, 1))
    w2 = _xavier_uniform(k[2], (64, 64), 64, 64)
    b2 = _linear_bias(k[3], 64, (64, 1))
    w3 = _xavier_uniform(k[4], (64, 1), 64, 1)
    b3 = _linear_bias(k[5], 64, (1,))
    return (w1, b1, w2, b2, w3, b3)


def _reference(x, params):
    w1, b1, w2, b2, w3, b3 = params
    h = jnp.maximum(x @ w1.T + b1[:, 0][None, :], 0.0)
    h = jnp.maximum(h @ w2.T + b2[:, 0][None, :], 0.0)
    return h @ w3 + b3[None, :]


if __name__ == "__main__":
    key = jax.random.PRNGKey(0)
    k_params, k_x, k_params2, k_x2 = jax.random.split(key, 4)

    # Case 1: small single-tile batch.
    input_size = 32
    batch = 16
    params = init_params(k_params, input_size)
    x = jax.random.normal(k_x, (batch, input_size), jnp.float32)
    out = jax.block_until_ready(feed_forward_regressor(x, params))
    ref = _reference(x, params)
    assert out.shape == (batch, 1), out.shape
    assert jnp.allclose(out, ref, atol=1e-4, rtol=1e-4), "mismatch (single tile)"

    # Case 2: multi-tile batch — exercises index_maps for i > 0 and the
    # batch-padding path (300 rows -> 2 tiles of 256 lanes).
    input_size2 = 40
    batch2 = 300
    params2 = init_params(k_params2, input_size2)
    x2 = jax.random.normal(k_x2, (batch2, input_size2), jnp.float32)
    out2 = jax.block_until_ready(feed_forward_regressor(x2, params2, tile_b=256))
    ref2 = _reference(x2, params2)
    assert out2.shape == (batch2, 1), out2.shape
    assert jnp.allclose(out2, ref2, atol=1e-4, rtol=1e-4), "mismatch (multi tile)"

    # Case 3: bf16 streaming path (looser tolerance, same semantics).
    out_bf16 = jax.block_until_ready(
        feed_forward_regressor(x2, params2, use_bf16=True))
    assert out_bf16.shape == (batch2, 1), out_bf16.shape
    assert jnp.allclose(out_bf16, ref2, atol=5e-2, rtol=5e-2), "mismatch (bf16)"

    print("KERNEL_OK")
</pallas_src>

<mosaic_0001>
module attributes {stable_mosaic.version = 11 : i64} {
  func.func @_mlp_kernel(%arg0: i32, %arg1: memref<32x128xf32, #tpu.memory_space<vmem>>, %arg2: memref<64x32xf32, #tpu.memory_space<vmem>>, %arg3: memref<64x1xf32, #tpu.memory_space<vmem>>, %arg4: memref<64x64xf32, #tpu.memory_space<vmem>>, %arg5: memref<64x1xf32, #tpu.memory_space<vmem>>, %arg6: memref<64x1xf32, #tpu.memory_space<vmem>>, %arg7: memref<1xf32, #tpu.memory_space<smem>>, %arg8: memref<1x128xf32, #tpu.memory_space<vmem>>) attributes {dimension_semantics = [#tpu.dimension_semantics<parallel>], iteration_bounds = array<i64: 1>, scalar_prefetch = 0 : i64, scratch_operands = 0 : i64, tpu.core_type = #tpu.core_type<tc>, window_params = [{transform_indices = @transform_0, window_bounds = array<i64: 32, 128>}, {pipeline_mode = #tpu.pipeline_mode<synchronous>, transform_indices = @transform_1, window_bounds = array<i64: 64, 32>}, {pipeline_mode = #tpu.pipeline_mode<synchronous>, transform_indices = @transform_2, window_bounds = array<i64: 64, 1>}, {pipeline_mode = #tpu.pipeline_mode<synchronous>, transform_indices = @transform_3, window_bounds = array<i64: 64, 64>}, {pipeline_mode = #tpu.pipeline_mode<synchronous>, transform_indices = @transform_4, window_bounds = array<i64: 64, 1>}, {pipeline_mode = #tpu.pipeline_mode<synchronous>, transform_indices = @transform_5, window_bounds = array<i64: 64, 1>}, {transform_indices = @transform_6, window_bounds = array<i64: 1>}, {transform_indices = @transform_7, window_bounds = array<i64: 1, 128>}]} {
    %c0 = arith.constant 0 : index
    %c0_0 = arith.constant 0 : index
    %0 = vector.load %arg1[%c0, %c0_0] : memref<32x128xf32, #tpu.memory_space<vmem>>, vector<32x128xf32>
    %c0_1 = arith.constant 0 : index
    %c0_2 = arith.constant 0 : index
    %1 = vector.load %arg2[%c0_1, %c0_2] : memref<64x32xf32, #tpu.memory_space<vmem>>, vector<64x32xf32>
    %cst = arith.constant dense<0.000000e+00> : vector<64x128xf32>
    %2 = tpu.matmul %1, %0, %cst {dimension_numbers = #tpu.dot_dimension_numbers<[1], [0], [0], [1], [0, 0, 1, 1], [], []>} : vector<64x32xf32>, vector<32x128xf32>, vector<64x128xf32> -> vector<64x128xf32>
    %c0_3 = arith.constant 0 : index
    %c0_4 = arith.constant 0 : index
    %3 = vector.load %arg3[%c0_3, %c0_4] : memref<64x1xf32, #tpu.memory_space<vmem>>, vector<64x1xf32>
    %4 = vector.broadcast %3 : vector<64x1xf32> to vector<64x128xf32>
    %5 = arith.addf %2, %4 : vector<64x128xf32>
    %cst_5 = arith.constant 0.000000e+00 : f32
    %6 = vector.broadcast %cst_5 : f32 to vector<64x128xf32>
    %7 = arith.maximumf %5, %6 : vector<64x128xf32>
    %c0_6 = arith.constant 0 : index
    %c0_7 = arith.constant 0 : index
    %8 = vector.load %arg4[%c0_6, %c0_7] : memref<64x64xf32, #tpu.memory_space<vmem>>, vector<64x64xf32>
    %cst_8 = arith.constant dense<0.000000e+00> : vector<64x128xf32>
    %9 = tpu.matmul %8, %7, %cst_8 {dimension_numbers = #tpu.dot_dimension_numbers<[1], [0], [0], [1], [0, 0, 1, 1], [], []>} : vector<64x64xf32>, vector<64x128xf32>, vector<64x128xf32> -> vector<64x128xf32>
    %c0_9 = arith.constant 0 : index
    %c0_10 = arith.constant 0 : index
    %10 = vector.load %arg5[%c0_9, %c0_10] : memref<64x1xf32, #tpu.memory_space<vmem>>, vector<64x1xf32>
    %11 = vector.broadcast %10 : vector<64x1xf32> to vector<64x128xf32>
    %12 = arith.addf %9, %11 : vector<64x128xf32>
    %cst_11 = arith.constant 0.000000e+00 : f32
    %13 = vector.broadcast %cst_11 : f32 to vector<64x128xf32>
    %14 = arith.maximumf %12, %13 : vector<64x128xf32>
    %c0_12 = arith.constant 0 : index
    %c0_13 = arith.constant 0 : index
    %15 = vector.load %arg6[%c0_12, %c0_13] : memref<64x1xf32, #tpu.memory_space<vmem>>, vector<64x1xf32>
    %16 = vector.broadcast %15 : vector<64x1xf32> to vector<64x128xf32>
    %17 = arith.mulf %14, %16 : vector<64x128xf32>
    %cst_14 = arith.constant dense<0.000000e+00> : vector<128xf32>
    %18 = vector.multi_reduction <add>, %17, %cst_14 [0] : vector<64x128xf32> to vector<128xf32>
    %19 = vector.shape_cast %18 : vector<128xf32> to vector<1x128xf32>
    %c0_15 = arith.constant 0 : index
    %20 = memref.load %arg7[%c0_15] : memref<1xf32, #tpu.memory_space<smem>>
    %21 = vector.broadcast %20 : f32 to vector<1x128xf32>
    %22 = arith.addf %19, %21 : vector<1x128xf32>
    %c0_16 = arith.constant 0 : index
    %c0_17 = arith.constant 0 : index
    %23 = vector.load %arg8[%c0_16, %c0_17] : memref<1x128xf32, #tpu.memory_space<vmem>>, vector<1x128xf32>
    tpu.vector_store %arg8[%c0_16, %c0_17], %22 {strides = array<i32>} : memref<1x128xf32, #tpu.memory_space<vmem>>, vector<1x128xf32>,
    return
  }
  func.func @transform_0(%arg0: i32) -> (i32, i32) {
    %c0_i32 = arith.constant 0 : i32
    %c0_i32_0 = arith.constant 0 : i32
    return %c0_i32, %arg0 : i32, i32
  }
  func.func @transform_1(%arg0: i32) -> (i32, i32) {
    %c0_i32 = arith.constant 0 : i32
    %c0_i32_0 = arith.constant 0 : i32
    %c0_i32_1 = arith.constant 0 : i32
    return %c0_i32, %c0_i32_0 : i32, i32
  }
  func.func @transform_2(%arg0: i32) -> (i32, i32) {
    %c0_i32 = arith.constant 0 : i32
    %c0_i32_0 = arith.constant 0 : i32
    %c0_i32_1 = arith.constant 0 : i32
    return %c0_i32, %c0_i32_0 : i32, i32
  }
  func.func @transform_3(%arg0: i32) -> (i32, i32) {
    %c0_i32 = arith.constant 0 : i32
    %c0_i32_0 = arith.constant 0 : i32
    %c0_i32_1 = arith.constant 0 : i32
    return %c0_i32, %c0_i32_0 : i32, i32
  }
  func.func @transform_4(%arg0: i32) -> (i32, i32) {
    %c0_i32 = arith.constant 0 : i32
    %c0_i32_0 = arith.constant 0 : i32
    %c0_i32_1 = arith.constant 0 : i32
    return %c0_i32, %c0_i32_0 : i32, i32
  }
  func.func @transform_5(%arg0: i32) -> (i32, i32) {
    %c0_i32 = arith.constant 0 : i32
    %c0_i32_0 = arith.constant 0 : i32
    %c0_i32_1 = arith.constant 0 : i32
    return %c0_i32, %c0_i32_0 : i32, i32
  }
  func.func @transform_6(%arg0: i32) -> i32 {
    %c0_i32 = arith.constant 0 : i32
    %c0_i32_0 = arith.constant 0 : i32
    return %c0_i32 : i32
  }
  func.func @transform_7(%arg0: i32) -> (i32, i32) {
    %c0_i32 = arith.constant 0 : i32
    %c0_i32_0 = arith.constant 0 : i32
    return %c0_i32, %arg0 : i32, i32
  }
}

</mosaic_0001>

<bundles_post_ra>
// kernel: tpu_custom_call.1
= control target key start
LH: loop header
LB: loop body
LE: loop exit
PB: predicated region body
PF: predicated region fallthrough
CT: control target
= control target key end

     0   :  { %vm88_vm0 = vcmask 261120   ;;  %v641_v3 = vmov 0   ;;  %s837_s0 = inlined_call_operand.vmem [shape: f32[32,128], index: 0, kind: input, shape index: {}]   ;;  %s838_s1 = inlined_call_operand.vmem [shape: f32[64,32], index: 1, kind: input, shape index: {}]   ;;  %s839_s2 = inlined_call_operand.vmem [shape: f32[64,1], index: 2, kind: input, shape index: {}]   ;;  %s840_s3 = inlined_call_operand.vmem [shape: f32[64,64], index: 3, kind: input, shape index: {}]   ;;  %s841_s4 = inlined_call_operand.vmem [shape: f32[64,1], index: 4, kind: input, shape index: {}]   ;;  %s842_s5 = inlined_call_operand.vmem [shape: f32[64,1], index: 5, kind: input, shape index: {}]   ;;  %s843_s6 = inlined_call_operand.<no memory space> [shape: f32[1], index: 6, kind: input, shape index: {}]   ;;  %s844_s7 = inlined_call_operand.hbm [shape: f32[1,128], index: 7, kind: output, shape index: {}]  }
   0x1   :  { %v31_v0 = vld [vmem:[%s837_s0 + $0x18] sm:$0xff]  ;;  %v30_v1 = vld [vmem:[%s837_s0 + $0x10] sm:$0xff]  ;;  %v32_v2 = vld [vmem:[%s838_s1] sm:$0xff]  ;;  %617 = vset.pattern.permute.xlu0 %v641_v3  ;;  %618 = vset.pattern.permute.xlu1 %v641_v3 }
   0x2   :  { %551 = vmatprep.subr.mxu0 %v31_v0  ;;  %v29_v4 = vld [vmem:[%s837_s0 + $0x8] sm:$0xff]  ;;  %559 = vmatprep.mubr.msk.f32.mxu0 %vm88_vm0, %v32_v2  ;;  %v28_v5 = vld [vmem:[%s837_s0] sm:$0xff]  ;;  %v47_v6 = vld [vmem:[%s839_s2 + $0x38] sm:$0xff] }
   0x3   :  { %552 = vmatpush3.msra.mxu0 %v31_v0  ;;  %v45_v7 = vld [vmem:[%s839_s2 + $0x28] sm:$0xff]  ;;  %85 = vperm.xlu0 %617, %v47_v6   ;;  %v46_v9 = vld [vmem:[%s839_s2 + $0x30] sm:$0xff]  ;;  %v44_v11 = vld [vmem:[%s839_s2 + $0x20] sm:$0xff] }
   0x4   :  { %553 = vmatprep.subr.mxu0 %v30_v1  ;;  %v33_v8 = vld [vmem:[%s838_s1 + $0x8] sm:$0xff]  ;;  %75 = vperm.xlu1 %618, %v45_v7   ;;  %v34_v10 = vld [vmem:[%s838_s1 + $0x10] sm:$0xff]  ;;  %v35_v12 = vld [vmem:[%s838_s1 + $0x18] sm:$0xff] }
   0x5   :  { %554 = vmatpush3.msra.mxu0 %v30_v1  ;;  %v43_v13 = vld [vmem:[%s839_s2 + $0x18] sm:$0xff]  ;;  %v36_v14 = vld [vmem:[%s838_s1 + $0x20] sm:$0xff]  ;;  %v42_v15 = vld [vmem:[%s839_s2 + $0x10] sm:$0xff] }
   0x6   :  { %555 = vmatprep.subr.mxu0 %v29_v4 }
   0x7   :  { %556 = vmatpush3.msra.mxu0 %v29_v4  ;;  %80 = vperm.xlu0 %617, %v46_v9  }
   0x8   :  { %557 = vmatprep.subr.mxu0 %v28_v5  ;;  %70 = vperm.xlu1 %618, %v44_v11  }
   0x9   :  { %558 = vmatpush3.msra.mxu0 %v28_v5 }
   0xa   :  { %560 = vmatmul.mubr.msk.f32.vlgmr.msra.gmra.mxu0 %vm88_vm0, %v33_v8 }
   0xb   :  { %562 = vmatprep.mubr.msk.f32.mxu0 %vm88_vm0, %v34_v10 }
   0xc   :  { %13 = vsyncpa [#allocation4], 0  ;;  %65 = vperm.xlu0 %617, %v43_v13   ;;  %v37_v16 = vld [vmem:[%s838_s1 + $0x28] sm:$0xff]  ;;  %60 = vperm.xlu1 %618, %v42_v15   ;;  %v38_v18 = vld [vmem:[%s838_s1 + $0x30] sm:$0xff]  ;;  %vm282_vm1 = vcmask 523264   ;;  %s642_s12 = smov [#allocation3]  }
   0xd   :  { %v41_v17 = vld [vmem:[%s839_s2 + $0x8] sm:$0xff]  ;;  %v40_v19 = vld [vmem:[%s839_s2] sm:$0xff]  ;;  %v39_v20 = vld [vmem:[%s838_s1 + $0x38] sm:$0xff]  ;;  %s499_s13 = sshll.u32 %s642_s12, 4  ;;  %s500_s13 = int_to_ptr.vmem [resolvable:$true] %s499_s13 }
   0xe   :  { %563 = vmatmul.mubr.msk.f32.gmra.mxu0 %vm88_vm0, %v35_v12  ;;  %v234_v21 = vld [vmem:[%s841_s4] sm:$0xff]  ;;  %v235_v22 = vld [vmem:[%s841_s4 + $0x8] sm:$0xff]  ;;  %v236_v23 = vld [vmem:[%s841_s4 + $0x10] sm:$0xff]  ;;  %s619_s14 = scalar_lea.vmem %s500_s13, 16  ;;  %s623_s15 = scalar_lea.vmem %s500_s13, 32 }
   0xf   :  { %565 = vmatprep.mubr.msk.f32.mxu0 %vm88_vm0, %v36_v14  ;;  %v237_v24 = vld [vmem:[%s841_s4 + $0x18] sm:$0xff]  ;;  %v420_v25 = vld [vmem:[%s842_s5] sm:$0xff]  ;;  %v421_v26 = vld [vmem:[%s842_s5 + $0x8] sm:$0xff]  ;;  %p620_p0 = scmp.ne.s32.totalorder %s500_s13, %s619_s14  ;;  %p624_p1 = scmp.lt.s32.totalorder %s500_s13, %s500_s13 }
  0x10   :  { %55 = vperm.xlu0 %617, %v41_v17   ;;  %50 = vperm.xlu1 %618, %v40_v19   ;;  %v238_v27 = vld [vmem:[%s841_s4 + $0x20] sm:$0xff]  ;;  %v422_v28 = vld [vmem:[%s842_s5 + $0x10] sm:$0xff]  ;;  %v239_v29 = vld [vmem:[%s841_s4 + $0x28] sm:$0xff]  ;;  %p625_p2 = scmp.lt.s32.totalorder %s623_s15, %s619_s14 }
  0x11   :  { %v423_v30 = vld [vmem:[%s842_s5 + $0x18] sm:$0xff]  ;;  %v240_v31 = vld [vmem:[%s841_s4 + $0x30] sm:$0xff]  ;;  %v424_v32 = vld [vmem:[%s842_s5 + $0x20] sm:$0xff] }
  0x12   :  { %566 = vmatmul.mubr.msk.f32.gmra.mxu0 %vm88_vm0, %v37_v16  ;;  %v241_v33 = vld [vmem:[%s841_s4 + $0x38] sm:$0xff]  ;;  %v425_v34 = vld [vmem:[%s842_s5 + $0x28] sm:$0xff]  ;;  %v426_v35 = vld [vmem:[%s842_s5 + $0x30] sm:$0xff]  ;;  %p626_p3 = por %p625_p2, %p624_p1 }
  0x13   :  { %568 = vmatprep.mubr.msk.f32.mxu0 %vm88_vm0, %v38_v18  ;;  %v427_v36 = vld [vmem:[%s842_s5 + $0x38] sm:$0xff]  ;;  %v226_v37 = vld [vmem:[%s840_s3] sm:$0xff]  ;;  %v228_v38 = vld [vmem:[%s840_s3 + $0x10] sm:$0xff] }
  0x14   :  { %244 = vperm.xlu0 %617, %v234_v21   ;;  %249 = vperm.xlu1 %618, %v235_v22   ;;  %v227_v7 = vld [vmem:[%s840_s3 + $0x8] sm:$0xff]  ;;  %v229_v8 = vld [vmem:[%s840_s3 + $0x18] sm:$0xff]  ;;  %v230_v9 = vld [vmem:[%s840_s3 + $0x20] sm:$0xff]  ;;  %p627_p4 = pnand %p626_p3, %p620_p0 }
  0x15   :  { %590 = vmatprep.mubr.msk.f32.mxu1 %vm282_vm1, %v228_v38  ;;  %v231_v10 = vld [vmem:[%s840_s3 + $0x28] sm:$0xff]  ;;  %v232_v11 = vld [vmem:[%s840_s3 + $0x30] sm:$0xff]  ;;  %v233_v12 = vld [vmem:[%s840_s3 + $0x38] sm:$0xff] }
  0x16   :  { %569 = vmatmul.mubr.msk.f32.gmra.mxu0 %vm88_vm0, %v39_v20 }
  0x17   :  { %587 = vmatprep.mubr.msk.f32.mxu0 %vm282_vm1, %v226_v37 }
  0x18   :  { %254 = vperm.xlu0 %617, %v236_v23   ;;  %259 = vperm.xlu1 %618, %v237_v24  }
  0x1c   :  { %430 = vperm.xlu0 %617, %v420_v25   ;;  %435 = vperm.xlu1 %618, %v421_v26  }
  0x20   :  { %264 = vperm.xlu0 %617, %v238_v27   ;;  %440 = vperm.xlu1 %618, %v422_v28  }
  0x24   :  { %269 = vperm.xlu0 %617, %v239_v29   ;;  %445 = vperm.xlu1 %618, %v423_v30  }
  0x28   :  { %274 = vperm.xlu0 %617, %v240_v31   ;;  %450 = vperm.xlu1 %618, %v424_v32  }
  0x2c   :  { %279 = vperm.xlu0 %617, %v241_v33   ;;  %455 = vperm.xlu1 %618, %v425_v34  }
  0x30   :  { %460 = vperm.xlu0 %617, %v426_v35   ;;  %465 = vperm.xlu1 %618, %v427_v36  }
  0x7e   :  { %v86_v41 = vpop.permute.xlu0 %85 }
  0x7f   :  { %v76_v43 = vpop.permute.xlu1 %75 }
  0x82   :  { %v81_v46 = vpop.permute.xlu0 %80 }
  0x83   :  { %v71_v48 = vpop.permute.xlu1 %70 }
  0x87   :  { %v66_v55 = vpop.permute.xlu0 %65  ;;  %v61_v58 = vpop.permute.xlu1 %60 }
  0x8b   :  { %v56_v63 = vpop.permute.xlu0 %55  ;;  %v51_v2 = vpop.permute.xlu1 %50 }
  0x8f   :  { %v245_v13 = vpop.permute.xlu0 %244  ;;  %v250_v14 = vpop.permute.xlu1 %249 }
  0x93   :  { %v255_v15 = vpop.permute.xlu0 %254  ;;  %v260_v16 = vpop.permute.xlu1 %259 }
  0x97   :  { %v431_v17 = vpop.permute.xlu0 %430  ;;  %v436_v18 = vpop.permute.xlu1 %435 }
  0x9b   :  { %v265_v19 = vpop.permute.xlu0 %264  ;;  %v441_v20 = vpop.permute.xlu1 %440 }
  0x9f   :  { %v270_v21 = vpop.permute.xlu0 %269  ;;  %v446_v22 = vpop.permute.xlu1 %445 }
  0xa3   :  { %v275_v32 = vpop.permute.xlu0 %274  ;;  %v451_v36 = vpop.permute.xlu1 %450 }
  0xca   :  { %v561_v39 = vpop.f32.mrf.mxu0 }
  0xcb   :  { %v185_v0 = vadd.f32 %v561_v39, %v56_v63 }
  0xcc   :  { %v179_v40 = vpop.f32.mrf.mxu0 }
  0xcd   :  { %v180_v3 = vadd.f32 %v179_v40, %v51_v2  ;;  %v219_v5 = vmax.f32 %v185_v0, 0.0 }
  0xce   :  { %v564_v42 = vpop.f32.mrf.mxu0 }
  0xcf   :  { %v195_v59 = vadd.f32 %v564_v42, %v66_v55  ;;  %v218_v6 = vmax.f32 %v180_v3, 0.0 }
  0xd0   :  { %v189_v44 = vpop.f32.mrf.mxu0 }
  0xd1   :  { %v190_v61 = vadd.f32 %v189_v44, %v61_v58  ;;  %v221_v1 = vmax.f32 %v195_v59, 0.0 }
  0xd2   :  { %v567_v45 = vpop.f32.mrf.mxu0 }
  0xd3   :  { %v205_v52 = vadd.f32 %v567_v45, %v76_v43  ;;  %v220_v4 = vmax.f32 %v190_v61, 0.0 }
  0xd4   :  { %v199_v47 = vpop.f32.mrf.mxu0 }
  0xd5   :  { %v200_v56 = vadd.f32 %v199_v47, %v71_v48  ;;  %v223_v60 = vmax.f32 %v205_v52, 0.0  ;;  %v280_v47 = vpop.permute.xlu0 %279 }
  0xd6   :  { %v570_v49 = vpop.f32.mrf.mxu0 }
  0xd7   :  { %v215_v50 = vadd.f32 %v570_v49, %v86_v41  ;;  %v222_v62 = vmax.f32 %v200_v56, 0.0 }
  0xd8   :  { %v209_v51 = vpop.f32.mrf.mxu0 }
  0xd9   :  { %v225_v53 = vmax.f32 %v215_v50, 0.0  ;;  %v210_v54 = vadd.f32 %v209_v51, %v81_v46  ;;  %v461_v61 = vpop.permute.xlu0 %460 }
  0xdb   :  { %v224_v57 = vmax.f32 %v210_v54, 0.0  ;;  %571 = vmatprep.subr.mxu0 %v225_v53  ;;  %599 = vmatprep.subr.mxu1 %v225_v53  ;;  %v456_v54 = vpop.permute.xlu1 %455 }
  0xdc   :  { %572 = vmatpush3.msra.mxu0 %v225_v53  ;;  %607 = vmatpush3.msra.mxu1 %v225_v53 }
  0xdd   :  { %573 = vmatprep.subr.mxu0 %v224_v57  ;;  %600 = vmatprep.subr.mxu1 %v224_v57 }
  0xde   :  { %574 = vmatpush3.msra.mxu0 %v224_v57  ;;  %608 = vmatpush3.msra.mxu1 %v224_v57 }
  0xdf   :  { %575 = vmatprep.subr.mxu0 %v223_v60  ;;  %601 = vmatprep.subr.mxu1 %v223_v60  ;;  %v466_v0 = vpop.permute.xlu1 %465 }
  0xe0   :  { %576 = vmatpush3.msra.mxu0 %v223_v60  ;;  %609 = vmatpush3.msra.mxu1 %v223_v60 }
  0xe1   :  { %577 = vmatprep.subr.mxu0 %v222_v62  ;;  %602 = vmatprep.subr.mxu1 %v222_v62 }
  0xe2   :  { %578 = vmatpush3.msra.mxu0 %v222_v62  ;;  %610 = vmatpush3.msra.mxu1 %v222_v62 }
  0xe3   :  { %579 = vmatprep.subr.mxu0 %v221_v1  ;;  %603 = vmatprep.subr.mxu1 %v221_v1 }
  0xe4   :  { %580 = vmatpush3.msra.mxu0 %v221_v1  ;;  %611 = vmatpush3.msra.mxu1 %v221_v1 }
  0xe5   :  { %581 = vmatprep.subr.mxu0 %v220_v4  ;;  %604 = vmatprep.subr.mxu1 %v220_v4 }
  0xe6   :  { %582 = vmatpush3.msra.mxu0 %v220_v4  ;;  %612 = vmatpush3.msra.mxu1 %v220_v4 }
  0xe7   :  { %583 = vmatprep.subr.mxu0 %v219_v5  ;;  %605 = vmatprep.subr.mxu1 %v219_v5 }
  0xe8   :  { %584 = vmatpush3.msra.mxu0 %v219_v5  ;;  %613 = vmatpush3.msra.mxu1 %v219_v5 }
  0xe9   :  { %585 = vmatprep.subr.mxu0 %v218_v6  ;;  %606 = vmatprep.subr.mxu1 %v218_v6 }
  0xea   :  { %586 = vmatpush3.msra.mxu0 %v218_v6  ;;  %614 = vmatpush3.msra.mxu1 %v218_v6 }
  0xeb   :  { %588 = vmatmul.mubr.msk.f32.vlgmr.msra.gmra.mxu0 %vm282_vm1, %v227_v7  ;;  %591 = vmatmul.mubr.msk.f32.vlgmr.msra.gmra.mxu1 %vm282_vm1, %v229_v8 }
  0xec   :  { %593 = vmatprep.mubr.msk.f32.mxu1 %vm282_vm1, %v230_v9  ;;  %v490_v9 = vstv %s843_s6 }
  0xef   :  { %594 = vmatmul.mubr.msk.f32.gmra.mxu1 %vm282_vm1, %v231_v10 }
  0xf0   :  { %596 = vmatprep.mubr.msk.f32.mxu1 %vm282_vm1, %v232_v11 }
  0xf3   :  { %597 = vmatmul.mubr.msk.f32.gmra.mxu1 %vm282_vm1, %v233_v12 }
 0x1ab   :  { %v589_v23 = vpop.f32.mrf.mxu0  ;;  %v592_v24 = vpop.f32.mrf.mxu1 }
 0x1ac   :  { %v379_v25 = vadd.f32 %v589_v23, %v250_v14  ;;  %v389_v26 = vadd.f32 %v592_v24, %v260_v16 }
 0x1ad   :  { %v373_v27 = vpop.f32.mrf.mxu0  ;;  %v383_v28 = vpop.f32.mrf.mxu1 }
 0x1ae   :  { %v413_v29 = vmax.f32 %v379_v25, 0.0  ;;  %v374_v30 = vadd.f32 %v373_v27, %v245_v13  ;;  %v384_v31 = vadd.f32 %v383_v28, %v255_v15  ;;  %v415_v37 = vmax.f32 %v389_v26, 0.0 }
 0x1af   :  { %v595_v33 = vpop.f32.mrf.mxu1 }
 0x1b0   :  { %v412_v34 = vmax.f32 %v374_v30, 0.0  ;;  %v414_v35 = vmax.f32 %v384_v31, 0.0  ;;  %v469_v39 = vmul.f32 %v436_v18, %v413_v29  ;;  %v399_v41 = vadd.f32 %v595_v33, %v270_v21 }
 0x1b1   :  { %v393_v38 = vpop.f32.mrf.mxu1  ;;  %v471_v48 = vmul.f32 %v446_v22, %v415_v37 }
 0x1b2   :  { %v468_v40 = vmul.f32 %v431_v17, %v412_v34  ;;  %v394_v42 = vadd.f32 %v393_v38, %v265_v19  ;;  %v470_v45 = vmul.f32 %v441_v20, %v414_v35  ;;  %v417_v51 = vmax.f32 %v399_v41, 0.0 }
 0x1b3   :  { %v598_v43 = vpop.f32.mrf.mxu1 }
 0x1b4   :  { %v476_v44 = vadd.f32 %v469_v39, %v468_v40  ;;  %v416_v46 = vmax.f32 %v394_v42, 0.0  ;;  %v409_v52 = vadd.f32 %v598_v43, %v280_v47  ;;  %v473_v58 = vmul.f32 %v456_v54, %v417_v51 }
 0x1b5   :  { %v403_v49 = vpop.f32.mrf.mxu1 }
 0x1b6   :  { %v477_v50 = vadd.f32 %v476_v44, %v470_v45  ;;  %v404_v53 = vadd.f32 %v403_v49, %v275_v32  ;;  %v472_v55 = vmul.f32 %v451_v36, %v416_v46  ;;  %v419_v60 = vmax.f32 %v409_v52, 0.0 }
 0x1b8   :  { %v478_v56 = vadd.f32 %v477_v50, %v471_v48  ;;  %v418_v57 = vmax.f32 %v404_v53, 0.0  ;;  %v475_v1 = vmul.f32 %v466_v0, %v419_v60 }
 0x1ba   :  { %v479_v59 = vadd.f32 %v478_v56, %v472_v55  ;;  %v474_v62 = vmul.f32 %v461_v61, %v418_v57 }
 0x1bc   :  { %v480_v63 = vadd.f32 %v479_v59, %v473_v58 }
 0x1be   :  { %v481_v2 = vadd.f32 %v480_v63, %v474_v62 }
 0x1c0   :  { %v482_v3 = vadd.f32 %v481_v2, %v475_v1 }
 0x1c2   :  { %v483_v4 = vrot.slane %v482_v3, 4 }
 0x1c4   :  { %v484_v5 = vadd.f32 %v483_v4, %v482_v3 }
 0x1c6   :  { %v485_v6 = vrot.slane %v484_v5, 2 }
 0x1c8   :  { %v486_v7 = vadd.f32 %v485_v6, %v484_v5 }
 0x1ca   :  { %v487_v8 = vrot.slane %v486_v7, 1 }
 0x1cc   :  { %v488_v10 = vadd.f32 %v487_v8, %v486_v7 }
 0x1ce   :  { %v491_v11 = vadd.f32 %v490_v9, %v488_v10 }
 0x1d0   :  { %492 = vst [vmem:[#allocation3] sm:$0x1] %v491_v11 }
 0x1d1   :  { %630 = shalt.err (!%p627_p4)
}
 0x1d2   :  { %502 = dma.vmem_to_hbm [thread:$0]  %s500_s13, 16, %s844_s7, [#allocation4]  }
 0x1d3   :  { %639 = dma.done.wait [#allocation4], 16  }
 0x1d4   :  { %640 = vsyncadd [#allocation4], 4294967280 }
 0x1d5   :  { %506 = vsyncpa [#allocation4], 1 }

</bundles_post_ra>
